<compile_context>
chip_gen: v7x
topology: tpu7x:2x2x1
jax: 0.10.0
libtpu: 0.0.40
codegen_flags: <defaults>
</compile_context>

<pallas_src>
import functools

import jax
import jax.numpy as jnp
from jax.experimental import pallas as pl
from jax.experimental.pallas import tpu as pltpu


def _fused_double_convt_gelu_kernel(x_ref, w1b1_ref, w2b2_ref, o_ref, *, cin, cmid):
    """x_ref: (m, Cin); w1b1_ref: (Cin+1, Cmid); w2b2_ref: (Cmid+1, Cout)."""

    def gelu_chain(v):
        # exactly the torch graph: 0.5*v * (tanh(0.79788456*(v + 0.044715*v^3)) + 1)
        v3 = v * v * v
        inner = (v + v3 * 0.044715) * 0.7978845608028654
        return (v * 0.5) * (jnp.tanh(inner) + 1.0)

    # static slices: weight rows vs. trailing bias row (zero-cost views)
    w1 = w1b1_ref[:cin, :]
    b1 = w1b1_ref[cin:cin + 1, :]          # (1, Cmid) broadcasts over rows
    w2 = w2b2_ref[:cmid, :]
    b2 = w2b2_ref[cmid:cmid + 1, :]

    # stage 1: 1x1 conv-transpose (channel matmul) + bias + GELU chain
    v = jnp.dot(x_ref[...], w1, preferred_element_type=jnp.float32) + b1
    v9 = gelu_chain(v)

    # stage 2: second 1x1 conv-transpose + bias + GELU chain (v9 stays in vregs)
    u = jnp.dot(v9, w2, preferred_element_type=jnp.float32) + b2
    o_ref[...] = gelu_chain(u)


def model_forward(x, params, *, tile_m=512):
    """x: (N, Cin, H, W) float32.  params = (w1, b1, w2, b2) with PyTorch
    ConvTranspose2d weight layout (Cin, Cout, 1, 1)."""
    w1, b1, w2, b2 = params
    pad1 = pad2 = 1
    N, Cin, H, W = x.shape
    # crop-before-matmul is only valid for kernel_size=1, stride=1
    assert w1.shape[0] == Cin and w1.shape[2:] == (1, 1)
    assert w2.shape[2:] == (1, 1)
    Cmid = w1.shape[1]
    Cout = w2.shape[1]
    assert w2.shape[0] == Cmid

    # Both paddings are pure crops; only pixels surviving both crops matter,
    # so crop once by pad1+pad2 (here: keeps only the center pixel).
    p = pad1 + pad2
    Ho, Wo = H - 2 * p, W - 2 * p
    assert Ho > 0 and Wo > 0, "padding too large for input"

    xc = x[:, :, p:H - p, p:W - p]                      # (N, Cin, Ho, Wo)
    if Ho == 1 and Wo == 1:
        x_rows = xc.reshape(N, Cin)                     # layout-free, no transpose
    else:
        x_rows = jnp.transpose(xc, (0, 2, 3, 1)).reshape(N * Ho * Wo, Cin)
    M = x_rows.shape[0]

    # Fold bias into the weight operand: one DMA per stage instead of two.
    w1b1 = jnp.concatenate([w1.reshape(Cin, Cmid), b1.reshape(1, Cmid)], axis=0)
    w2b2 = jnp.concatenate([w2.reshape(Cmid, Cout), b2.reshape(1, Cout)], axis=0)

    kernel = functools.partial(_fused_double_convt_gelu_kernel, cin=Cin, cmid=Cmid)

    cost = pl.CostEstimate(
        flops=2 * M * (Cin * Cmid + Cmid * Cout),
        transcendentals=M * (Cmid + Cout),
        bytes_accessed=4 * (M * Cin + (Cin + 1) * Cmid + (Cmid + 1) * Cout + M * Cout),
    )

    if M <= tile_m:
        # Tiny working set: whole-array VMEM blocks, no grid, no pipelining
        # machinery.  Entirely launch/DMA-latency bound, so keep it minimal.
        vmem = pl.BlockSpec(memory_space=pltpu.MemorySpace.VMEM)
        out_rows = pl.pallas_call(
            kernel,
            out_shape=jax.ShapeDtypeStruct((M, Cout), jnp.float32),
            in_specs=[vmem, vmem, vmem],
            out_specs=vmem,
            cost_estimate=cost,
            compiler_params=pltpu.CompilerParams(
                allow_input_fusion=[True, True, True]),
        )(x_rows, w1b1, w2b2)
    else:
        # General Ho,Wo>1 / large-M path: 1-D parallel grid over rows.
        # tile_m=512 keeps double-buffered tiles far below even v5e's 16 MiB
        # default scoped VMEM; "parallel" lets v7x split the grid across both
        # TensorCores.
        Mp = pl.cdiv(M, tile_m) * tile_m
        x_pad = jnp.pad(x_rows, ((0, Mp - M), (0, 0))) if Mp != M else x_rows
        out_rows = pl.pallas_call(
            kernel,
            out_shape=jax.ShapeDtypeStruct((Mp, Cout), jnp.float32),
            grid=(Mp // tile_m,),
            in_specs=[
                pl.BlockSpec((tile_m, Cin), lambda i: (i, 0)),
                pl.BlockSpec((Cin + 1, Cmid), lambda i: (0, 0)),
                pl.BlockSpec((Cmid + 1, Cout), lambda i: (0, 0)),
            ],
            out_specs=pl.BlockSpec((tile_m, Cout), lambda i: (i, 0)),
            cost_estimate=cost,
            compiler_params=pltpu.CompilerParams(
                dimension_semantics=("parallel",)),
        )(x_pad, w1b1, w2b2)
        out_rows = out_rows[:M]

    if Ho == 1 and Wo == 1:
        return out_rows.reshape(N, Cout, 1, 1)
    out = out_rows.reshape(N, Ho, Wo, Cout)
    return jnp.transpose(out, (0, 3, 1, 2))


def _reference_forward(x, params):
    """Pure-JAX reference implementing the original module literally
    (two crops, two full channel matmuls, two GELU chains)."""
    def convt1x1(x, w, b, pad):
        N, Cin, H, W = x.shape
        xc = x[:, :, pad:H - pad, pad:W - pad]
        v = jnp.einsum("nchw,cd->ndhw", xc, w.reshape(Cin, -1))
        return v + b[None, :, None, None]

    def gelu_chain(v):
        return (v * 0.5) * (jnp.tanh((v + 0.044715 * v * v * v)
                                     * 0.7978845608028654) + 1.0)

    w1, b1, w2, b2 = params
    v9 = gelu_chain(convt1x1(x, w1, b1, 1))
    return gelu_chain(convt1x1(v9, w2, b2, 1))


if __name__ == "__main__":
    key = jax.random.PRNGKey(0)
    kx, kw1, kb1, kw2, kb2 = jax.random.split(key, 5)

    # input shape from the module: (1, 32, 5, 5)
    x = jax.random.normal(kx, (1, 32, 5, 5), dtype=jnp.float32)

    # ConvTranspose2d weights: (in_channels, out_channels, kH, kW)
    bound1 = 1.0 / (32 ** 0.5)
    w1 = jax.random.uniform(kw1, (32, 30, 1, 1), jnp.float32, -bound1, bound1)
    b1 = jax.random.uniform(kb1, (30,), jnp.float32, -bound1, bound1)
    bound2 = 1.0 / (30 ** 0.5)
    w2 = jax.random.uniform(kw2, (30, 30, 1, 1), jnp.float32, -bound2, bound2)
    b2 = jax.random.uniform(kb2, (30,), jnp.float32, -bound2, bound2)

    params = (w1, b1, w2, b2)

    # jit the whole forward so the crop/reshape/bias-concat can fuse into the
    # pallas_call inputs (allow_input_fusion) instead of separate HBM hops.
    fwd = jax.jit(model_forward)
    out = jax.block_until_ready(fwd(x, params))
    ref = jax.block_until_ready(_reference_forward(x, params))

    assert out.shape == (1, 30, 1, 1), out.shape
    assert jnp.allclose(out, ref, atol=1e-5, rtol=1e-5), "mismatch vs reference"

    print("KERNEL_OK")
</pallas_src>

<mosaic_0001>
module attributes {stable_mosaic.version = 11 : i64} {
  func.func @_fused_double_convt_gelu_kernel(%arg0: memref<1x32xf32, #tpu.memory_space<vmem>>, %arg1: memref<33x30xf32, #tpu.memory_space<vmem>>, %arg2: memref<31x30xf32, #tpu.memory_space<vmem>>, %arg3: memref<1x30xf32, #tpu.memory_space<vmem>>) attributes {dimension_semantics = [], scalar_prefetch = 0 : i64, scratch_operands = 0 : i64, tpu.core_type = #tpu.core_type<tc>} {
    %c0 = arith.constant 0 : index
    %c0_0 = arith.constant 0 : index
    %0 = vector.load %arg1[%c0, %c0_0] : memref<33x30xf32, #tpu.memory_space<vmem>>, vector<32x30xf32>
    %c32 = arith.constant 32 : index
    %c0_1 = arith.constant 0 : index
    %1 = vector.load %arg1[%c32, %c0_1] : memref<33x30xf32, #tpu.memory_space<vmem>>, vector<1x30xf32>
    %c0_2 = arith.constant 0 : index
    %c0_3 = arith.constant 0 : index
    %2 = vector.load %arg2[%c0_2, %c0_3] : memref<31x30xf32, #tpu.memory_space<vmem>>, vector<30x30xf32>
    %c30 = arith.constant 30 : index
    %c0_4 = arith.constant 0 : index
    %3 = vector.load %arg2[%c30, %c0_4] : memref<31x30xf32, #tpu.memory_space<vmem>>, vector<1x30xf32>
    %c0_5 = arith.constant 0 : index
    %c0_6 = arith.constant 0 : index
    %4 = vector.load %arg0[%c0_5, %c0_6] : memref<1x32xf32, #tpu.memory_space<vmem>>, vector<1x32xf32>
    %cst = arith.constant dense<0.000000e+00> : vector<1x30xf32>
    %5 = tpu.matmul %4, %0, %cst {dimension_numbers = #tpu.dot_dimension_numbers<[1], [0], [0], [1], [0, 0, 1, 1], [], []>} : vector<1x32xf32>, vector<32x30xf32>, vector<1x30xf32> -> vector<1x30xf32>
    %6 = arith.addf %5, %1 : vector<1x30xf32>
    %7 = arith.mulf %6, %6 : vector<1x30xf32>
    %8 = arith.mulf %7, %6 : vector<1x30xf32>
    %cst_7 = arith.constant 4.471500e-02 : f32
    %9 = vector.broadcast %cst_7 : f32 to vector<1x30xf32>
    %10 = arith.mulf %8, %9 : vector<1x30xf32>
    %11 = arith.addf %6, %10 : vector<1x30xf32>
    %cst_8 = arith.constant 0.797884583 : f32
    %12 = vector.broadcast %cst_8 : f32 to vector<1x30xf32>
    %13 = arith.mulf %11, %12 : vector<1x30xf32>
    %cst_9 = arith.constant 5.000000e-01 : f32
    %14 = vector.broadcast %cst_9 : f32 to vector<1x30xf32>
    %15 = arith.mulf %6, %14 : vector<1x30xf32>
    %16 = math.tanh %13 : vector<1x30xf32>
    %cst_10 = arith.constant 1.000000e+00 : f32
    %17 = vector.broadcast %cst_10 : f32 to vector<1x30xf32>
    %18 = arith.addf %16, %17 : vector<1x30xf32>
    %19 = arith.mulf %15, %18 : vector<1x30xf32>
    %cst_11 = arith.constant dense<0.000000e+00> : vector<1x30xf32>
    %20 = tpu.matmul %19, %2, %cst_11 {dimension_numbers = #tpu.dot_dimension_numbers<[1], [0], [0], [1], [0, 0, 1, 1], [], []>} : vector<1x30xf32>, vector<30x30xf32>, vector<1x30xf32> -> vector<1x30xf32>
    %21 = arith.addf %20, %3 : vector<1x30xf32>
    %22 = arith.mulf %21, %21 : vector<1x30xf32>
    %23 = arith.mulf %22, %21 : vector<1x30xf32>
    %cst_12 = arith.constant 4.471500e-02 : f32
    %24 = vector.broadcast %cst_12 : f32 to vector<1x30xf32>
    %25 = arith.mulf %23, %24 : vector<1x30xf32>
    %26 = arith.addf %21, %25 : vector<1x30xf32>
    %cst_13 = arith.constant 0.797884583 : f32
    %27 = vector.broadcast %cst_13 : f32 to vector<1x30xf32>
    %28 = arith.mulf %26, %27 : vector<1x30xf32>
    %cst_14 = arith.constant 5.000000e-01 : f32
    %29 = vector.broadcast %cst_14 : f32 to vector<1x30xf32>
    %30 = arith.mulf %21, %29 : vector<1x30xf32>
    %31 = math.tanh %28 : vector<1x30xf32>
    %cst_15 = arith.constant 1.000000e+00 : f32
    %32 = vector.broadcast %cst_15 : f32 to vector<1x30xf32>
    %33 = arith.addf %31, %32 : vector<1x30xf32>
    %34 = arith.mulf %30, %33 : vector<1x30xf32>
    %c0_16 = arith.constant 0 : index
    %c0_17 = arith.constant 0 : index
    %35 = vector.load %arg3[%c0_16, %c0_17] : memref<1x30xf32, #tpu.memory_space<vmem>>, vector<1x30xf32>
    tpu.vector_store %arg3[%c0_16, %c0_17], %34 {strides = array<i32>} : memref<1x30xf32, #tpu.memory_space<vmem>>, vector<1x30xf32>,
    return
  }
}

</mosaic_0001>

<bundles_post_ra>
// kernel: model_forward.2
= control target key start
LH: loop header
LB: loop body
LE: loop exit
PB: predicated region body
PF: predicated region fallthrough
CT: control target
= control target key end

     0   :  { %s717_s0 = inlined_call_operand.vmem [shape: f32[1,30], index: 0, kind: input, shape index: {}]   ;;  %s718_s1 = inlined_call_operand.<no memory space> [shape: f32[], index: 1, kind: input, shape index: {}]   ;;  %s719_s2 = inlined_call_operand.vmem [shape: f32[32,30], index: 2, kind: input, shape index: {}]   ;;  %s720_s3 = inlined_call_operand.vmem [shape: f32[1,30], index: 3, kind: input, shape index: {}]   ;;  %s721_s4 = inlined_call_operand.vmem [shape: f32[30,30], index: 4, kind: input, shape index: {}]   ;;  %s722_s5 = inlined_call_operand.hbm [shape: f32[1,32,5,5], index: 5, kind: input, shape index: {}]   ;;  %s723_s6 = inlined_call_operand.hbm [shape: f32[1,30], index: 6, kind: output, shape index: {}]  }
   0x1   :  { %v623_v0 = vstv %s718_s1 }
   0x2   :  { %15 = vsyncpa [#allocation28], 0 }
   0x3   :  { %16 = vsyncpa [#allocation29], 0  ;;  %s22_s25 = scalar_lea.hbm %s722_s5, 192  ;;  %s579_s26 = smov [#allocation27]  }
   0x4   :  { %s24_s27 = sshll.u32 %s579_s26, 4  ;;  %s552_s30 = scalar_lea.hbm %s722_s5, 208  ;;  %s25_s27 = int_to_ptr.vmem [resolvable:$true] %s24_s27 }
   0x5   :  { %p529_p0 = scmp.ne.s32.totalorder %s22_s25, %s552_s30  ;;  %s530_s9 = scalar_lea.hbm %s722_s5, 400 }
   0x6   :  { %p531_p1 = scmp.lt.u32.totalorder %s22_s25, %s722_s5  ;;  %p532_p2 = scmp.lt.u32.totalorder %s530_s9, %s552_s30 }
   0x7   :  { %p534_p4 = scmp.lt.u32.totalorder %s552_s30, %s22_s25 }
   0x8   :  { %p533_p3 = por %p532_p2, %p531_p1 }
   0xa   :  { %p535_p5 = por %p534_p4, %p533_p3 }
   0xc   :  { %p536_p6 = pnand %p535_p5, %p529_p0 }
   0xe   :  { %539 = shalt.err (!%p536_p6)
}
   0xf   :  { %s540_s11 = scalar_lea.vmem %s25_s27, 16  ;;  %s544_s12 = scalar_lea.vmem %s25_s27, 32 }
  0x10   :  { %p541_p7 = scmp.ne.s32.totalorder %s25_s27, %s540_s11  ;;  %p545_p8 = scmp.lt.s32.totalorder %s25_s27, %s25_s27 }
  0x11   :  { %p546_p9 = scmp.lt.s32.totalorder %s544_s12, %s540_s11 }
  0x13   :  { %p547_p10 = por %p546_p9, %p545_p8 }
  0x15   :  { %p548_p11 = pnand %p547_p10, %p541_p7 }
  0x17   :  { %551 = shalt.err (!%p548_p11)
}
  0x18   :  { %27 = dma.hbm_to_vmem [thread:$0]  %s22_s25, 16, %s25_s27, [#allocation28]  }
  0x19   :  { %575 = dma.done.wait [#allocation28], 16  }
  0x1a   :  { %576 = vsyncadd [#allocation28], 4294967280  ;;  %v97_v1 = vlaneseq  ;;  %v580_v2 = vmov 0.0|0.0   ;;  %vm581_vm0 = vmmov 0   ;;  %v582_v3 = vmov 0.0   ;;  %v96_v7 = vld [vmem:[%s719_s2] sm:$0xff] }
  0x1b   :  { %505 = vmatprep.subr.bf16.mxu0 %v580_v2  ;;  %491 = vmatprep.mubr.msk.f32.mxu0 %vm581_vm0, %v582_v3  ;;  %v464_v8 = vld [vmem:[%s719_s2 + $0x8] sm:$0xff]  ;;  %v465_v9 = vld [vmem:[%s719_s2 + $0x10] sm:$0xff]  ;;  %v466_v13 = vld [vmem:[%s719_s2 + $0x18] sm:$0xff]  ;;  %vm271_vm3 = vcmask 261120   ;;  %vm238_vm4 = vcmask 1041408   ;;  %vm358_vm6 = vcmask 1045504  }
  0x1c   :  { %v98_v4 = vand.u32 127, %v97_v1  ;;  %v151_v5 = vshrl.u32 %v97_v1, 7  ;;  %511 = vmatprep.subr.bf16.mxu1 %v580_v2  ;;  %502 = vmatprep.mubr.msk.f32.mxu1 %vm581_vm0, %v582_v3  ;;  %v87_v14 = vld [vmem:[#allocation27] sm:$0x1]  ;;  %v469_v32 = vld [vmem:[%s721_s4 + $0x18] sm:$0xff]  ;;  %v467_v37 = vld [vmem:[%s721_s4 + $0x8] sm:$0xff] }
  0x1d   :  { %v95_v15 = vld [vmem:[%s717_s0] sm:$0x1]  ;;  %89 = vst [vmem:[#allocation31] sm:$0x1] %v87_v14  ;;  %v468_v38 = vld [vmem:[%s721_s4 + $0x10] sm:$0xff]  ;;  %vm583_vm7 = vmmov 1  }
  0x1e   :  { %v152_v6 = vadd.s32 32, %v151_v5  ;;  %vm100_vm1 = vcmp.lt.s32.totalorder %v98_v4, 30  ;;  %v172_v27 = vld [vmem:[%s720_s3] sm:$0x1]  ;;  %v245_v29 = vadd.s32 24, %v151_v5  ;;  %vm516_vm8 = vmpackc.low %vm358_vm6, %vm583_vm7  ;;  %vm354_vm9 = vcmask 244736  }
  0x1f   :  { %v101_v10 = vsel %vm100_vm1, %v96_v7, %v623_v0  ;;  %v114_v11 = vsel %vm100_vm1, %v464_v8, %v623_v0  ;;  %v128_v12 = vsel %vm100_vm1, %v465_v9, %v623_v0  ;;  %v142_v19 = vsel %vm100_vm1, %v466_v13, %v623_v0  ;;  %v173_v36 = vld [vmem:[%s721_s4] sm:$0xff]  ;;  %s584_s4 = smov [#allocation30]  }
  0x20   :  { %vm153_vm2 = vcmp.lt.s32.totalorder %v152_v6, 33  ;;  %v104_v16 = vmax.f32 %v101_v10, %v623_v0  ;;  %v117_v17 = vmax.f32 %v114_v11, %v623_v0  ;;  %v131_v18 = vmax.f32 %v128_v12, %v623_v0  ;;  %s449_s29 = sshll.u32 %s584_s4, 4  ;;  %s450_s29 = int_to_ptr.vmem [resolvable:$true] %s449_s29 }
  0x21   :  { %v145_v20 = vmax.f32 %v142_v19, %v623_v0  ;;  %v154_v21 = vsel %vm153_vm2, %v95_v15, %v623_v0  ;;  %v232_v28 = vsel %vm153_vm2, %v172_v27, %v623_v0  ;;  %vm246_vm5 = vcmp.lt.s32.totalorder %v245_v29, 30  ;;  %s553_s30 = scalar_lea.vmem %s450_s29, 16  ;;  %s557_s7 = scalar_lea.vmem %s450_s29, 32 }
  0x22   :  { %v506_v22 = vpack.c.bf16 %v117_v17, %v104_v16  ;;  %v159_v23 = vsel %vm100_vm1, %v154_v21, %v623_v0  ;;  %v237_v30 = vsel %vm100_vm1, %v232_v28, %v623_v0  ;;  %v247_v34 = vsel %vm246_vm5, %v469_v32, %v623_v0  ;;  %p554_p12 = scmp.ne.s32.totalorder %s450_s29, %s553_s30  ;;  %p558_p13 = scmp.lt.s32.totalorder %s450_s29, %s450_s29 }
  0x23   :  { %v162_v24 = vmax.f32 %v623_v0, %v159_v23  ;;  %v509_v25 = vpack.c.bf16 %v145_v20, %v131_v18  ;;  %v239_v31 = vsel %vm238_vm4, %v237_v30, %v623_v0  ;;  %v252_v35 = vsel %vm100_vm1, %v247_v34, %v623_v0  ;;  %p559_p0 = scmp.lt.s32.totalorder %s557_s7, %s553_s30 }
  0x24   :  { %507 = vmatpush3.bf16.msra.mxu0 %v506_v22  ;;  %v270_v26 = vld [vmem:[#allocation31] sm:$0x1]  ;;  %v240_v33 = vrot.slane %v239_v31, 2  ;;  %v183_v40 = vsel %vm100_vm1, %v173_v36, %v623_v0  ;;  %v201_v41 = vsel %vm100_vm1, %v467_v37, %v623_v0  ;;  %v220_v42 = vsel %vm100_vm1, %v468_v38, %v623_v0 }
  0x25   :  { %508 = vmatprep.subr.bf16.mxu0 %v580_v2  ;;  %166 = vst [vmem:[#allocation32 + $0x20] sm:$0xff] %v162_v24  ;;  %v186_v43 = vmax.f32 %v183_v40, %v623_v0  ;;  %v204_v44 = vmax.f32 %v201_v41, %v623_v0  ;;  %v223_v45 = vmax.f32 %v220_v42, %v623_v0  ;;  %vm441_vm10 = vcmask 237568   ;;  %p560_p1 = por %p559_p0, %p558_p13 }
  0x26   :  { %v255_v39 = vmax.f32 %v252_v35, %v240_v33 }
  0x27   :  { %v512_v46 = vpack.c.bf16 %v204_v44, %v186_v43  ;;  %p561_p2 = pnand %p560_p1, %p554_p12 }
  0x28   :  { %510 = vmatpush3.bf16.msra.mxu0 %v509_v25  ;;  %259 = vst [vmem:[#allocation33 + $0x18] sm:$0xff] %v255_v39 }
  0x29   :  { %513 = vmatpush3.bf16.msra.mxu1 %v512_v46 }
  0x2a   :  { %514 = vmatprep.subr.bf16.mxu1 %v580_v2 }
  0x2b   :  { %492 = vmatmul.mubr.msk.f32.vlgmr.msra.gmra.mrb[0].mxu0 %vm271_vm3, %v270_v26 }
  0x2c   :  { %v264_v49 = vld [vmem:[#allocation32 + $0x20] sm:$0x1] }
  0x2f   :  { %v268_v47 = vld [vmem:[#allocation33 + $0x18] sm:$0x3f]  ;;  %v269_v62 = vld [vmem:[#allocation33 + $0x1e] sm:$0x1] }
  0x30   :  { %v515_v48 = vpack.c.bf16 %v268_v47, %v223_v45 }
  0x32   :  { %517 = vmatpush3.bf16.msk.msra.mxu1 %vm516_vm8, %v515_v48 }
  0xfe   :  { %v341_v50 = vpop.f32.mrb[0].mxu0 }
  0xff   :  { %v342_v51 = vadd.f32 %v341_v50, %v264_v49  ;;  %v493_v52 = vpop.f32.mrb[1].mxu0 }
 0x101   :  { %v345_v53 = vmul.f32 %v342_v51, %v342_v51  ;;  %v350_v59 = vmul.f32 0.5, %v342_v51 }
 0x103   :  { %v346_v54 = vmul.f32 %v345_v53, %v342_v51 }
 0x105   :  { %v347_v55 = vmul.f32 0.044715, %v346_v54 }
 0x107   :  { %v348_v56 = vadd.f32 %v347_v55, %v342_v51 }
 0x109   :  { %v349_v57 = vmul.f32 0.7978846, %v348_v56 }
 0x10b   :  { %524 = vtanh.f32 %v349_v57 }
 0x115   :  { %v525_v58 = vpop.eup %524 }
 0x116   :  { %v352_v60 = vadd.f32 1.0, %v525_v58 }
 0x118   :  { %v353_v61 = vmul.f32 %v352_v60, %v350_v59 }
 0x11a   :  { %503 = vmatmul.mubr.msk.f32.vlgmr.msra.gmra.mrb[0].mxu1 %vm354_vm9, %v353_v61 }
 0x1ed   :  { %v428_v63 = vpop.f32.mrb[0].mxu1 }
 0x1ee   :  { %v429_v0 = vadd.f32 %v428_v63, %v269_v62  ;;  %v504_v1 = vpop.f32.mrb[1].mxu1 }
 0x1f0   :  { %v432_v2 = vmul.f32 %v429_v0, %v429_v0  ;;  %v437_v8 = vmul.f32 0.5, %v429_v0 }
 0x1f2   :  { %v433_v3 = vmul.f32 %v432_v2, %v429_v0 }
 0x1f4   :  { %v434_v4 = vmul.f32 0.044715, %v433_v3 }
 0x1f6   :  { %v435_v5 = vadd.f32 %v434_v4, %v429_v0 }
 0x1f8   :  { %v436_v6 = vmul.f32 0.7978846, %v435_v5 }
 0x1fa   :  { %526 = vtanh.f32 %v436_v6 }
 0x204   :  { %v527_v7 = vpop.eup %526 }
 0x205   :  { %v439_v9 = vadd.f32 1.0, %v527_v7 }
 0x207   :  { %v440_v10 = vmul.f32 %v439_v9, %v437_v8 }
 0x209   :  { %442 = vst.msk [vmem:[#allocation30] sm:$0x1] %vm441_vm10, %v440_v10 }
 0x20a   :  { %564 = shalt.err (!%p561_p2)
}
 0x20b   :  { %s565_s1 = scalar_lea.hbm %s723_s6, 16 }
 0x20c   :  { %p566_p3 = scmp.ne.s32.totalorder %s723_s6, %s565_s1  ;;  %p569_p4 = scmp.lt.u32.totalorder %s565_s1, %s723_s6 }
 0x20e   :  { %p571_p5 = pnand %p569_p4, %p566_p3 }
 0x210   :  { %574 = shalt.err (!%p571_p5)
}
 0x211   :  { %452 = dma.vmem_to_hbm [thread:$0]  %s450_s29, 16, %s723_s6, [#allocation29]  }
 0x212   :  { %577 = dma.done.wait [#allocation29], 16  }
 0x213   :  { %578 = vsyncadd [#allocation29], 4294967280 }
 0x214   :  { %456 = vsyncpa [#allocation28], 1 }
 0x215   :  { %457 = vsyncpa [#allocation29], 1 }

</bundles_post_ra>
